<compile_context>
chip_gen: v5e
topology: v5e:2x2
jax: 0.10.0
libtpu: 0.0.40
codegen_flags: <defaults>
</compile_context>

<pallas_src>
import jax
import jax.numpy as jnp
from jax.experimental import pallas as pl
from jax.experimental.pallas import tpu as pltpu


def mlp_kernel(alpha_ref, x_ref, w1_ref, b1_ref, w2_ref, b2_ref, o_ref):
    # Layer 1: Linear(num_input -> hidden_pad)  (MXU, f32 accumulation)
    h = jnp.dot(x_ref[...], w1_ref[...], preferred_element_type=jnp.float32)
    h = h + b1_ref[...]                                  # (TB, Hp) + (1, Hp)

    # PReLU with a single shared parameter (PyTorch default num_parameters=1).
    alpha = alpha_ref[0]                                 # scalar read from SMEM
    h = jnp.where(h >= 0, h, alpha * h)

    # Layer 2: Linear(hidden_pad -> num_output)
    out = jnp.dot(h, w2_ref[...], preferred_element_type=jnp.float32)
    o_ref[...] = (out + b2_ref[...]).astype(o_ref.dtype)


def _round_up(x, m):
    return ((x + m - 1) // m) * m


def mlp_forward(x, w1, b1, alpha, w2, b2, *, tile_b=2048):
    """x: (B, num_input) f32. w1: (in, hidden), b1: (1, hidden), alpha: scalar-ish,
    w2: (hidden, out), b2: (1, out). Returns (B, num_output) f32."""
    B, num_input = x.shape
    hidden = w1.shape[1]
    num_output = w2.shape[1]

    # --- Pad hidden dim to a full lane width (128). Zero padding is a numeric no-op. ---
    hidden_pad = _round_up(hidden, 128)
    if hidden_pad != hidden:
        w1 = jnp.pad(w1, ((0, 0), (0, hidden_pad - hidden)))
        b1 = jnp.pad(b1, ((0, 0), (0, hidden_pad - hidden)))
        w2 = jnp.pad(w2, ((0, hidden_pad - hidden), (0, 0)))

    # --- Choose batch tile (multiple of 8, capped at tile_b) and pad batch. ---
    tile = min(tile_b, max(8, _round_up(B, 8)))
    tile = _round_up(tile, 8)
    B_pad = _round_up(B, tile)
    if B_pad != B:
        x = jnp.pad(x, ((0, B_pad - B), (0, 0)))

    alpha_s = jnp.reshape(alpha, (1,)).astype(jnp.float32)   # scalar-prefetch -> SMEM

    grid = (B_pad // tile,)

    # index_maps receive the scalar-prefetch ref as a trailing positional arg.
    grid_spec = pltpu.PrefetchScalarGridSpec(
        num_scalar_prefetch=1,
        grid=grid,
        in_specs=[
            pl.BlockSpec((tile, num_input), lambda i, a: (i, 0)),          # x (streamed)
            pl.BlockSpec((num_input, hidden_pad), lambda i, a: (0, 0)),    # w1 (resident)
            pl.BlockSpec((1, hidden_pad), lambda i, a: (0, 0)),            # b1 (resident)
            pl.BlockSpec((hidden_pad, num_output), lambda i, a: (0, 0)),   # w2 (resident)
            pl.BlockSpec((1, num_output), lambda i, a: (0, 0)),            # b2 (resident)
        ],
        out_specs=pl.BlockSpec((tile, num_output), lambda i, a: (i, 0)),   # out (streamed)
    )

    flops = 2 * B_pad * (num_input * hidden_pad + hidden_pad * num_output)
    bytes_accessed = 4 * (
        B_pad * num_input + B_pad * num_output
        + w1.size + b1.size + w2.size + b2.size
    )

    out = pl.pallas_call(
        mlp_kernel,
        out_shape=jax.ShapeDtypeStruct((B_pad, num_output), jnp.float32),
        grid_spec=grid_spec,
        compiler_params=pltpu.CompilerParams(
            dimension_semantics=("parallel",),       # megacore-shard batch on v7x
            vmem_limit_bytes=32 * 1024 * 1024,       # safe within v7x's 64 MiB VMEM
        ),
        cost_estimate=pl.CostEstimate(
            flops=flops, transcendentals=0, bytes_accessed=bytes_accessed),
    )(alpha_s, x, w1, b1, w2, b2)

    return out[:B]


def init_params(key, num_input=35, hidden_output=100, num_output=5):
    """Deterministic parameter init mimicking nn.Linear's uniform(-1/sqrt(fan_in), +)."""
    k1, k2, k3, k4 = jax.random.split(key, 4)
    bound1 = 1.0 / jnp.sqrt(num_input)
    bound2 = 1.0 / jnp.sqrt(hidden_output)
    # Stored pre-transposed: (in, out)
    w1 = jax.random.uniform(k1, (num_input, hidden_output), jnp.float32, -bound1, bound1)
    b1 = jax.random.uniform(k2, (1, hidden_output), jnp.float32, -bound1, bound1)
    w2 = jax.random.uniform(k3, (hidden_output, num_output), jnp.float32, -bound2, bound2)
    b2 = jax.random.uniform(k4, (1, num_output), jnp.float32, -bound2, bound2)
    alpha = jnp.full((1,), 0.25, dtype=jnp.float32)  # PReLU default init
    return w1, b1, alpha, w2, b2


if __name__ == "__main__":
    num_input, hidden_output, num_output = 35, 100, 5
    batch = 8  # small test batch; wrapper pads to the tile internally

    key = jax.random.PRNGKey(0)
    k_x, k_p = jax.random.split(key)
    x = jax.random.normal(k_x, (batch, num_input), dtype=jnp.float32)
    w1, b1, alpha, w2, b2 = init_params(k_p, num_input, hidden_output, num_output)

    out = mlp_forward(x, w1, b1, alpha, w2, b2)
    out = jax.block_until_ready(out)

    # Reference check in plain JAX (unpadded weights)
    h_ref = x @ w1 + b1
    h_ref = jnp.where(h_ref >= 0, h_ref, 0.25 * h_ref)
    ref = h_ref @ w2 + b2
    assert out.shape == (batch, num_output)
    assert jnp.allclose(out, ref, atol=1e-5, rtol=1e-5)

    print("KERNEL_OK")
</pallas_src>

<mosaic_0001>
module attributes {stable_mosaic.version = 11 : i64} {
  func.func @mlp_kernel(%arg0: i32, %arg1: memref<1xf32, #tpu.memory_space<smem>>, %arg2: memref<8x35xf32, #tpu.memory_space<vmem>>, %arg3: memref<35x128xf32, #tpu.memory_space<vmem>>, %arg4: memref<1x128xf32, #tpu.memory_space<vmem>>, %arg5: memref<128x5xf32, #tpu.memory_space<vmem>>, %arg6: memref<1x5xf32, #tpu.memory_space<vmem>>, %arg7: memref<8x5xf32, #tpu.memory_space<vmem>>) attributes {dimension_semantics = [#tpu.dimension_semantics<parallel>], iteration_bounds = array<i64: 1>, scalar_prefetch = 1 : i64, scratch_operands = 0 : i64, tpu.core_type = #tpu.core_type<tc>, window_params = [{transform_indices = @transform_0, window_bounds = array<i64: 8, 35>}, {pipeline_mode = #tpu.pipeline_mode<synchronous>, transform_indices = @transform_1, window_bounds = array<i64: 35, 128>}, {pipeline_mode = #tpu.pipeline_mode<synchronous>, transform_indices = @transform_2, window_bounds = array<i64: 1, 128>}, {pipeline_mode = #tpu.pipeline_mode<synchronous>, transform_indices = @transform_3, window_bounds = array<i64: 128, 5>}, {pipeline_mode = #tpu.pipeline_mode<synchronous>, transform_indices = @transform_4, window_bounds = array<i64: 1, 5>}, {transform_indices = @transform_5, window_bounds = array<i64: 8, 5>}]} {
    %c0 = arith.constant 0 : index
    %c0_0 = arith.constant 0 : index
    %0 = vector.load %arg2[%c0, %c0_0] : memref<8x35xf32, #tpu.memory_space<vmem>>, vector<8x35xf32>
    %c0_1 = arith.constant 0 : index
    %c0_2 = arith.constant 0 : index
    %1 = vector.load %arg3[%c0_1, %c0_2] : memref<35x128xf32, #tpu.memory_space<vmem>>, vector<35x128xf32>
    %cst = arith.constant dense<0.000000e+00> : vector<8x128xf32>
    %2 = tpu.matmul %0, %1, %cst {dimension_numbers = #tpu.dot_dimension_numbers<[1], [0], [0], [1], [0, 0, 1, 1], [], []>} : vector<8x35xf32>, vector<35x128xf32>, vector<8x128xf32> -> vector<8x128xf32>
    %c0_3 = arith.constant 0 : index
    %c0_4 = arith.constant 0 : index
    %3 = vector.load %arg4[%c0_3, %c0_4] : memref<1x128xf32, #tpu.memory_space<vmem>>, vector<1x128xf32>
    %4 = vector.broadcast %3 : vector<1x128xf32> to vector<8x128xf32>
    %5 = arith.addf %2, %4 : vector<8x128xf32>
    %c0_5 = arith.constant 0 : index
    %6 = memref.load %arg1[%c0_5] : memref<1xf32, #tpu.memory_space<smem>>
    %cst_6 = arith.constant 0.000000e+00 : f32
    %7 = vector.broadcast %cst_6 : f32 to vector<8x128xf32>
    %8 = arith.cmpf oge, %5, %7 : vector<8x128xf32>
    %9 = vector.broadcast %6 : f32 to vector<8x128xf32>
    %10 = arith.mulf %9, %5 : vector<8x128xf32>
    %11 = arith.select %8, %5, %10 : vector<8x128xi1>, vector<8x128xf32>
    %c0_7 = arith.constant 0 : index
    %c0_8 = arith.constant 0 : index
    %12 = vector.load %arg5[%c0_7, %c0_8] : memref<128x5xf32, #tpu.memory_space<vmem>>, vector<128x5xf32>
    %cst_9 = arith.constant dense<0.000000e+00> : vector<8x5xf32>
    %13 = tpu.matmul %11, %12, %cst_9 {dimension_numbers = #tpu.dot_dimension_numbers<[1], [0], [0], [1], [0, 0, 1, 1], [], []>} : vector<8x128xf32>, vector<128x5xf32>, vector<8x5xf32> -> vector<8x5xf32>
    %c0_10 = arith.constant 0 : index
    %c0_11 = arith.constant 0 : index
    %14 = vector.load %arg6[%c0_10, %c0_11] : memref<1x5xf32, #tpu.memory_space<vmem>>, vector<1x5xf32>
    %15 = vector.broadcast %14 : vector<1x5xf32> to vector<8x5xf32>
    %16 = arith.addf %13, %15 : vector<8x5xf32>
    %c0_12 = arith.constant 0 : index
    %c0_13 = arith.constant 0 : index
    %17 = vector.load %arg7[%c0_12, %c0_13] : memref<8x5xf32, #tpu.memory_space<vmem>>, vector<8x5xf32>
    tpu.vector_store %arg7[%c0_12, %c0_13], %16 {strides = array<i32>} : memref<8x5xf32, #tpu.memory_space<vmem>>, vector<8x5xf32>,
    return
  }
  func.func @transform_0(%arg0: i32, %arg1: memref<1xf32, #tpu.memory_space<smem>>) -> (i32, i32) {
    %c0_i32 = arith.constant 0 : i32
    %c0_i32_0 = arith.constant 0 : i32
    return %arg0, %c0_i32 : i32, i32
  }
  func.func @transform_1(%arg0: i32, %arg1: memref<1xf32, #tpu.memory_space<smem>>) -> (i32, i32) {
    %c0_i32 = arith.constant 0 : i32
    %c0_i32_0 = arith.constant 0 : i32
    %c0_i32_1 = arith.constant 0 : i32
    return %c0_i32, %c0_i32_0 : i32, i32
  }
  func.func @transform_2(%arg0: i32, %arg1: memref<1xf32, #tpu.memory_space<smem>>) -> (i32, i32) {
    %c0_i32 = arith.constant 0 : i32
    %c0_i32_0 = arith.constant 0 : i32
    %c0_i32_1 = arith.constant 0 : i32
    return %c0_i32, %c0_i32_0 : i32, i32
  }
  func.func @transform_3(%arg0: i32, %arg1: memref<1xf32, #tpu.memory_space<smem>>) -> (i32, i32) {
    %c0_i32 = arith.constant 0 : i32
    %c0_i32_0 = arith.constant 0 : i32
    %c0_i32_1 = arith.constant 0 : i32
    return %c0_i32, %c0_i32_0 : i32, i32
  }
  func.func @transform_4(%arg0: i32, %arg1: memref<1xf32, #tpu.memory_space<smem>>) -> (i32, i32) {
    %c0_i32 = arith.constant 0 : i32
    %c0_i32_0 = arith.constant 0 : i32
    %c0_i32_1 = arith.constant 0 : i32
    return %c0_i32, %c0_i32_0 : i32, i32
  }
  func.func @transform_5(%arg0: i32, %arg1: memref<1xf32, #tpu.memory_space<smem>>) -> (i32, i32) {
    %c0_i32 = arith.constant 0 : i32
    %c0_i32_0 = arith.constant 0 : i32
    return %arg0, %c0_i32 : i32, i32
  }
}

</mosaic_0001>

<bundles_post_ra>
// kernel: tpu_custom_call.1
= control target key start
LH: loop header
LB: loop body
LE: loop exit
PB: predicated region body
PF: predicated region fallthrough
CT: control target
= control target key end

     0   :  { %vm37_vm0 = vcmask 1042432   ;;  %vm33_vm1 = vcmask 285696   ;;  %s269_s0 = inlined_call_operand.<no memory space> [shape: f32[1], index: 0, kind: input, shape index: {}]   ;;  %s270_s1 = inlined_call_operand.vmem [shape: f32[8,35], index: 1, kind: input, shape index: {}]   ;;  %s271_s2 = inlined_call_operand.vmem [shape: f32[35,128], index: 2, kind: input, shape index: {}]   ;;  %s272_s3 = inlined_call_operand.vmem [shape: f32[1,128], index: 3, kind: input, shape index: {}]   ;;  %s273_s4 = inlined_call_operand.vmem [shape: f32[128,5], index: 4, kind: input, shape index: {}]   ;;  %s274_s5 = inlined_call_operand.vmem [shape: f32[1,5], index: 5, kind: input, shape index: {}]   ;;  %s275_s6 = inlined_call_operand.hbm [shape: f32[8,5], index: 6, kind: output, shape index: {}]  }
   0x1   :  { %v28_v0 = vld [vmem:[%s271_s2 + $0x20] sm:$0x7]  ;;  %v27_v1 = vld [vmem:[%s271_s2 + $0x18] sm:$0xff]  ;;  %v26_v2 = vld [vmem:[%s271_s2 + $0x10] sm:$0xff] }
   0x2   :  { %124 = vmatpush.msk.msra.mxu0 %vm37_vm0, %v28_v0  ;;  %v81_v3 = vld [vmem:[%s273_s4 + $0x78] sm:$0xff]  ;;  %v80_v4 = vld [vmem:[%s273_s4 + $0x70] sm:$0xff]  ;;  %v25_v5 = vld [vmem:[%s271_s2 + $0x8] sm:$0xff] }
   0x3   :  { %86 = vmatpush.msra.mxu1 %v81_v3  ;;  %v79_v6 = vld [vmem:[%s273_s4 + $0x68] sm:$0xff]  ;;  %v24_v7 = vld [vmem:[%s271_s2] sm:$0xff] }
   0x4   :  { %53 = vmatpush.msra.mxu0 %v27_v1  ;;  %v78_v8 = vld [vmem:[%s273_s4 + $0x60] sm:$0xff] }
   0x5   :  { %87 = vmatpush.msra.mxu1 %v80_v4  ;;  %v23_v9 = vld [vmem:[%s270_s1] sm:$0xff] }
   0x6   :  { %54 = vmatpush.msra.mxu0 %v26_v2 }
   0x7   :  { %88 = vmatpush.msra.mxu1 %v79_v6 }
   0x8   :  { %55 = vmatpush.msra.mxu0 %v25_v5 }
   0x9   :  { %12 = vsyncpa [#allocation5], 0  ;;  %v77_v10 = vld [vmem:[%s273_s4 + $0x58] sm:$0xff]  ;;  %89 = vmatpush.msra.mxu1 %v78_v8  ;;  %v76_v11 = vld [vmem:[%s273_s4 + $0x50] sm:$0xff]  ;;  %v63_v24 = vstv %s269_s0  ;;  %vm106_vm3 = vcmask 39936  }
   0xa   :  { %56 = vmatpush.msra.mxu0 %v24_v7  ;;  %v75_v12 = vld [vmem:[%s273_s4 + $0x48] sm:$0xff]  ;;  %v74_v13 = vld [vmem:[%s273_s4 + $0x40] sm:$0xff]  ;;  %v73_v14 = vld [vmem:[%s273_s4 + $0x38] sm:$0xff] }
   0xb   :  { %125 = vmatmul.msk.f32.vlgmr.msra.gmra.mxu0 %vm33_vm1, %v23_v9  ;;  %90 = vmatpush.msra.mxu1 %v77_v10  ;;  %v72_v15 = vld [vmem:[%s273_s4 + $0x30] sm:$0xff]  ;;  %v71_v16 = vld [vmem:[%s273_s4 + $0x28] sm:$0xff]  ;;  %v70_v17 = vld [vmem:[%s273_s4 + $0x20] sm:$0xff] }
   0xc   :  { %v69_v18 = vld [vmem:[%s273_s4 + $0x18] sm:$0xff]  ;;  %v68_v19 = vld [vmem:[%s273_s4 + $0x10] sm:$0xff]  ;;  %v67_v20 = vld [vmem:[%s273_s4 + $0x8] sm:$0xff] }
   0xd   :  { %91 = vmatpush.msra.mxu1 %v76_v11  ;;  %v66_v21 = vld [vmem:[%s273_s4] sm:$0xff]  ;;  %s155_s4 = smov [#allocation4]  }
   0xe   :  { %v127_v22 = vld [vmem:[%s272_s3] ss:$0 sm:$0xff]  ;;  %s113_s20 = sshll.u32 %s155_s4, 4  ;;  %s115_s3 = sshll.u32 %s275_s6, 4  ;;  %s114_s20 = int_to_ptr.vmem [resolvable:$true] %s113_s20  ;;  %s116_s3 = int_to_ptr.hbm [resolvable:$true] %s115_s3 }
   0xf   :  { %92 = vmatpush.msra.mxu1 %v75_v12  ;;  %v128_v28 = vld [vmem:[%s274_s5] ss:$0 sm:$0xff] }
  0x11   :  { %93 = vmatpush.msra.mxu1 %v74_v13 }
  0x13   :  { %94 = vmatpush.msra.mxu1 %v73_v14 }
  0x15   :  { %95 = vmatpush.msra.mxu1 %v72_v15 }
  0x17   :  { %96 = vmatpush.msra.mxu1 %v71_v16 }
  0x19   :  { %97 = vmatpush.msra.mxu1 %v70_v17 }
  0x1b   :  { %98 = vmatpush.msra.mxu1 %v69_v18 }
  0x1d   :  { %99 = vmatpush.msra.mxu1 %v68_v19 }
  0x1f   :  { %100 = vmatpush.msra.mxu1 %v67_v20 }
  0x21   :  { %101 = vmatpush.msra.mxu1 %v66_v21 }
  0x88   :  { %v58_v23 = vpop.f32.mrf.mxu0 }
  0x89   :  { %v59_v25 = vadd.f32 %v127_v22, %v58_v23 }
  0x8b   :  { %vm62_vm2 = vcmp.ge.f32.partialorder %v59_v25, 0.0  ;;  %v64_v26 = vmul.f32 %v63_v24, %v59_v25 }
  0x8d   :  { %v65_v27 = vsel %vm62_vm2, %v59_v25, %v64_v26 }
  0x8e   :  { %102 = vmatmul.f32.vlgmr.msra.gmra.mxu1 %v65_v27 }
 0x10b   :  { %v103_v29 = vpop.f32.mrf.mxu1 }
 0x10c   :  { %v104_v30 = vadd.f32 %v128_v28, %v103_v29 }
 0x10e   :  { %107 = vst.msk [vmem:[#allocation4] sm:$0xff] %vm106_vm3, %v104_v30 }
 0x10f   :  { %118 = dma.vmem_to_hbm [thread:$0]  %s114_s20, 128, %s116_s3, [#allocation5]  }
 0x110   :  { %153 = dma.done.wait [#allocation5], 128  }
 0x111   :  { %154 = vsyncadd [#allocation5], 4294967168 }
 0x112   :  { %123 = vsyncpa [#allocation5], 1 }

</bundles_post_ra>
